<compile_context>
chip_gen: v5e
topology: v5e:2x2
jax: 0.10.0
libtpu: 0.0.40
codegen_flags: <defaults>
</compile_context>

<pallas_src>
import functools

import jax
import jax.numpy as jnp
from jax.experimental import pallas as pl
from jax.experimental.pallas import tpu as pltpu


_LANES = 128
# Padding value for logits: with target 0 it yields bce = 0, probs = 0,
# focal = 0, so the padded elements contribute exactly zero loss.
_NEUTRAL_LOGIT = -1.0e4


def _round_up(x, m):
    return (x + m - 1) // m * m


def _focal_loss_kernel(x_ref, t_ref, out_ref, *, alpha, gamma):
    i = pl.program_id(1)            # arbitrary (reduction) axis

    @pl.when(i == 0)
    def _():
        out_ref[...] = jnp.zeros_like(out_ref)

    x = x_ref[...].astype(jnp.float32)
    t = t_ref[...].astype(jnp.float32)
    tile_rows, lanes = x_ref.shape

    # One exp per element, shared between the numerically-stable BCE and the
    # sigmoid:
    #   bce        = max(x, 0) - x*t + log1p(exp(-|x|))
    #   sigmoid(x) = 1/(1+e)  (x >= 0)   or   e/(1+e)  (x < 0),  e = exp(-|x|)
    e = jnp.exp(-jnp.abs(x))
    bce = jnp.maximum(x, 0.0) - x * t + jnp.log1p(e)
    inv = pl.reciprocal(1.0 + e, approx=False)
    probs = jnp.where(x >= 0.0, inv, e * inv)

    # 1 - pt,  where pt = t*p + (1-t)*(1-p)
    one_minus_pt = t * (1.0 - probs) + (1.0 - t) * probs

    # Focal weight: integer gamma -> multiply chain (no EUP pow); else pow.
    g = float(gamma)
    if g.is_integer() and 0 <= int(g) <= 8:
        gi = int(g)
        if gi == 0:
            focal = jnp.ones_like(one_minus_pt)
        else:
            focal = one_minus_pt
            for _ in range(gi - 1):
                focal = focal * one_minus_pt
    else:
        focal = jnp.power(one_minus_pt, jnp.float32(g))

    loss = (jnp.float32(alpha) * focal) * bce

    # Padded elements were filled with (logit=-1e4, target=0), which produce
    # exactly zero loss, so no per-element index mask is needed here.

    # VPU-only partial reduction: fold sublane groups of 8 into the resident
    # (8, 128) output block.  The single cross-lane reduce happens once, in
    # the wrapper, over a tiny (num_cores*8, 128) array.
    out_ref[...] += jnp.sum(loss.reshape(tile_rows // 8, 8, lanes), axis=0)


def focal_loss(logits, targets, alpha=0.25, gamma=2.0, reduction="mean",
               tile_rows=1024):
    assert logits.shape == targets.shape
    n = int(logits.size)
    lanes = _LANES

    rows = pl.cdiv(n, lanes)
    rows8 = _round_up(rows, 8)

    # Don't over-pad tiny inputs: collapse to a single full-array block.
    tile_rows = max(8, min(int(tile_rows), rows8))
    tile_rows = _round_up(tile_rows, 8)

    n_tiles = pl.cdiv(rows8, tile_rows)
    num_cores = 2 if n_tiles >= 2 else 1          # v7x: 2 TCs; elsewhere harmless
    padded_rows = _round_up(rows8, num_cores * tile_rows)
    steps = padded_rows // (num_cores * tile_rows)
    pad = padded_rows * lanes - n

    # Keep native floating dtype on the HBM side (halves traffic for bf16);
    # cast non-float inputs (e.g. bool/int targets) to f32.
    x_dt = logits.dtype if jnp.issubdtype(logits.dtype, jnp.floating) else jnp.float32
    t_dt = targets.dtype if jnp.issubdtype(targets.dtype, jnp.floating) else jnp.float32
    xf = logits.reshape(-1).astype(x_dt)
    tf = targets.reshape(-1).astype(t_dt)
    if pad:
        xf = jnp.pad(xf, (0, pad), constant_values=_NEUTRAL_LOGIT)
        tf = jnp.pad(tf, (0, pad), constant_values=0)
    x2d = xf.reshape(padded_rows, lanes)
    t2d = tf.reshape(padded_rows, lanes)

    kernel = functools.partial(
        _focal_loss_kernel, alpha=float(alpha), gamma=float(gamma))

    in_map = lambda c, i: (c * steps + i, 0)

    partials = pl.pallas_call(
        kernel,
        out_shape=jax.ShapeDtypeStruct((num_cores * 8, lanes), jnp.float32),
        grid_spec=pltpu.PrefetchScalarGridSpec(
            num_scalar_prefetch=0,
            grid=(num_cores, steps),
            in_specs=[
                pl.BlockSpec((tile_rows, lanes), in_map),
                pl.BlockSpec((tile_rows, lanes), in_map),
            ],
            out_specs=pl.BlockSpec((8, lanes), lambda c, i: (c, 0)),
        ),
        compiler_params=pltpu.CompilerParams(
            dimension_semantics=("parallel", "arbitrary")),
    )(x2d, t2d)

    total = jnp.sum(partials, dtype=jnp.float32)
    if reduction == "mean":
        return total / jnp.float32(n)
    return total


def focal_loss_ref(logits, targets, alpha=0.25, gamma=2.0, reduction="mean"):
    x = logits.astype(jnp.float32)
    t = targets.astype(jnp.float32)
    bce = jnp.maximum(x, 0.0) - x * t + jnp.log1p(jnp.exp(-jnp.abs(x)))
    probs = jax.nn.sigmoid(x)
    pt = t * probs + (1.0 - t) * (1.0 - probs)
    loss = alpha * jnp.power(1.0 - pt, gamma) * bce
    return jnp.mean(loss) if reduction == "mean" else jnp.sum(loss)


if __name__ == "__main__":
    key = jax.random.PRNGKey(0)
    k1, k2 = jax.random.split(key)

    # NCHW-shaped logits/targets like a small segmentation / detection head.
    B, C, H, W = 2, 4, 16, 16
    logits = jax.random.normal(k1, (B, C, H, W), dtype=jnp.float32) * 2.0
    targets = (jax.random.uniform(k2, (B, C, H, W)) > 0.5).astype(jnp.float32)

    out = focal_loss(logits, targets, alpha=0.25, gamma=2.0, reduction="mean")
    out = jax.block_until_ready(out)

    ref = focal_loss_ref(logits, targets)
    assert jnp.allclose(out, ref, rtol=1e-5, atol=1e-6), (out, ref)

    # Exercise the multi-tile / padded / two-partial (core-split) path too.
    big = 3 * 5 * 300 * 37  # not a multiple of 128
    xb = jax.random.normal(k1, (big,), dtype=jnp.float32) * 2.0
    tb = (jax.random.uniform(k2, (big,)) > 0.5).astype(jnp.float32)
    out_b = jax.block_until_ready(
        focal_loss(xb, tb, alpha=0.25, gamma=2.0, reduction="mean", tile_rows=512))
    ref_b = focal_loss_ref(xb, tb)
    assert jnp.allclose(out_b, ref_b, rtol=1e-5, atol=1e-6), (out_b, ref_b)

    # Sum reduction path.
    out_s = jax.block_until_ready(
        focal_loss(logits, targets, alpha=0.25, gamma=2.0, reduction="sum"))
    ref_s = focal_loss_ref(logits, targets, reduction="sum")
    assert jnp.allclose(out_s, ref_s, rtol=1e-5, atol=1e-5), (out_s, ref_s)

    print("KERNEL_OK")
</pallas_src>

<mosaic_0001>
module attributes {stable_mosaic.version = 11 : i64} {
  func.func @_focal_loss_kernel(%arg0: i32, %arg1: i32, %arg2: memref<16x128xf32, #tpu.memory_space<vmem>>, %arg3: memref<16x128xf32, #tpu.memory_space<vmem>>, %arg4: memref<8x128xf32, #tpu.memory_space<vmem>>) attributes {dimension_semantics = [#tpu.dimension_semantics<parallel>, #tpu.dimension_semantics<arbitrary>], iteration_bounds = array<i64: 1, 1>, scalar_prefetch = 0 : i64, scratch_operands = 0 : i64, tpu.core_type = #tpu.core_type<tc>, window_params = [{transform_indices = @transform_0, window_bounds = array<i64: 16, 128>}, {transform_indices = @transform_1, window_bounds = array<i64: 16, 128>}, {transform_indices = @transform_2, window_bounds = array<i64: 8, 128>}]} {
    %c0_i32 = arith.constant 0 : i32
    %0 = arith.cmpi eq, %arg1, %c0_i32 : i32
    %1 = arith.extui %0 : i1 to i32
    %c0_i32_0 = arith.constant 0 : i32
    %2 = arith.cmpi ne, %1, %c0_i32_0 : i32
    scf.if %2 {
      %cst_15 = arith.constant 0.000000e+00 : f32
      %38 = vector.broadcast %cst_15 : f32 to vector<8x128xf32>
      %c0_16 = arith.constant 0 : index
      %c0_17 = arith.constant 0 : index
      %39 = vector.load %arg4[%c0_16, %c0_17] : memref<8x128xf32, #tpu.memory_space<vmem>>, vector<8x128xf32>
      tpu.vector_store %arg4[%c0_16, %c0_17], %38 {strides = array<i32>} : memref<8x128xf32, #tpu.memory_space<vmem>>, vector<8x128xf32>,
    } else {
    }
    %c0 = arith.constant 0 : index
    %c0_1 = arith.constant 0 : index
    %3 = vector.load %arg2[%c0, %c0_1] : memref<16x128xf32, #tpu.memory_space<vmem>>, vector<16x128xf32>
    %c0_2 = arith.constant 0 : index
    %c0_3 = arith.constant 0 : index
    %4 = vector.load %arg3[%c0_2, %c0_3] : memref<16x128xf32, #tpu.memory_space<vmem>>, vector<16x128xf32>
    %5 = math.absf %3 : vector<16x128xf32>
    %cst = arith.constant 0.000000e+00 : f32
    %6 = vector.broadcast %cst : f32 to vector<16x128xf32>
    %7 = arith.subf %6, %5 : vector<16x128xf32>
    %8 = math.exp %7 : vector<16x128xf32>
    %cst_4 = arith.constant 0.000000e+00 : f32
    %9 = vector.broadcast %cst_4 : f32 to vector<16x128xf32>
    %10 = arith.maximumf %3, %9 : vector<16x128xf32>
    %11 = arith.mulf %3, %4 : vector<16x128xf32>
    %12 = arith.subf %10, %11 : vector<16x128xf32>
    %13 = math.log1p %8 : vector<16x128xf32>
    %14 = arith.addf %12, %13 : vector<16x128xf32>
    %cst_5 = arith.constant 1.000000e+00 : f32
    %15 = vector.broadcast %cst_5 : f32 to vector<16x128xf32>
    %16 = arith.addf %15, %8 : vector<16x128xf32>
    %17 = tpu.reciprocal %16 : vector<16x128xf32> -> vector<16x128xf32>
    %cst_6 = arith.constant 0.000000e+00 : f32
    %18 = vector.broadcast %cst_6 : f32 to vector<16x128xf32>
    %19 = arith.cmpf oge, %3, %18 : vector<16x128xf32>
    %20 = arith.mulf %8, %17 : vector<16x128xf32>
    %21 = arith.select %19, %17, %20 : vector<16x128xi1>, vector<16x128xf32>
    %cst_7 = arith.constant 1.000000e+00 : f32
    %22 = vector.broadcast %cst_7 : f32 to vector<16x128xf32>
    %23 = arith.subf %22, %21 : vector<16x128xf32>
    %24 = arith.mulf %4, %23 : vector<16x128xf32>
    %cst_8 = arith.constant 1.000000e+00 : f32
    %25 = vector.broadcast %cst_8 : f32 to vector<16x128xf32>
    %26 = arith.subf %25, %4 : vector<16x128xf32>
    %27 = arith.mulf %26, %21 : vector<16x128xf32>
    %28 = arith.addf %24, %27 : vector<16x128xf32>
    %29 = arith.mulf %28, %28 : vector<16x128xf32>
    %cst_9 = arith.constant 2.500000e-01 : f32
    %30 = vector.broadcast %cst_9 : f32 to vector<16x128xf32>
    %31 = arith.mulf %30, %29 : vector<16x128xf32>
    %32 = arith.mulf %31, %14 : vector<16x128xf32>
    %c0_10 = arith.constant 0 : index
    %c0_11 = arith.constant 0 : index
    %33 = vector.load %arg4[%c0_10, %c0_11] : memref<8x128xf32, #tpu.memory_space<vmem>>, vector<8x128xf32>
    %34 = vector.shape_cast %32 : vector<16x128xf32> to vector<2x8x128xf32>
    %cst_12 = arith.constant dense<0.000000e+00> : vector<8x128xf32>
    %35 = vector.multi_reduction <add>, %34, %cst_12 [0] : vector<2x8x128xf32> to vector<8x128xf32>
    %36 = arith.addf %33, %35 : vector<8x128xf32>
    %c0_13 = arith.constant 0 : index
    %c0_14 = arith.constant 0 : index
    %37 = vector.load %arg4[%c0_13, %c0_14] : memref<8x128xf32, #tpu.memory_space<vmem>>, vector<8x128xf32>
    tpu.vector_store %arg4[%c0_13, %c0_14], %36 {strides = array<i32>} : memref<8x128xf32, #tpu.memory_space<vmem>>, vector<8x128xf32>,
    return
  }
  func.func @transform_0(%arg0: i32, %arg1: i32) -> (i32, i32) {
    %c1_i32 = arith.constant 1 : i32
    %0 = arith.muli %arg0, %c1_i32 : i32
    %1 = arith.addi %0, %arg1 : i32
    %c0_i32 = arith.constant 0 : i32
    %c0_i32_0 = arith.constant 0 : i32
    return %1, %c0_i32 : i32, i32
  }
  func.func @transform_1(%arg0: i32, %arg1: i32) -> (i32, i32) {
    %c1_i32 = arith.constant 1 : i32
    %0 = arith.muli %arg0, %c1_i32 : i32
    %1 = arith.addi %0, %arg1 : i32
    %c0_i32 = arith.constant 0 : i32
    %c0_i32_0 = arith.constant 0 : i32
    return %1, %c0_i32 : i32, i32
  }
  func.func @transform_2(%arg0: i32, %arg1: i32) -> (i32, i32) {
    %c0_i32 = arith.constant 0 : i32
    %c0_i32_0 = arith.constant 0 : i32
    return %arg0, %c0_i32 : i32, i32
  }
}

</mosaic_0001>

<bundles_post_ra>
// kernel: tpu_custom_call.1
= control target key start
LH: loop header
LB: loop body
LE: loop exit
PB: predicated region body
PF: predicated region fallthrough
CT: control target
= control target key end

     0   :  { %7 = vsyncpa [#allocation3], 0  ;;  %s340_s0 = inlined_call_operand.hbm [shape: f32[16,128], index: 0, kind: input, shape index: {}]   ;;  %s341_s1 = inlined_call_operand.hbm [shape: f32[16,128], index: 1, kind: input, shape index: {}]   ;;  %s342_s2 = inlined_call_operand.hbm [shape: f32[8,128], index: 2, kind: output, shape index: {}]  }
   0x1   :  { %8 = vsyncpa [#allocation6], 0 }
   0x2   :  { %9 = vsyncpa [#allocation4], 0  ;;  %s18_s11 = sshll.u32 %s340_s0, 4  ;;  %s269_s12 = smov [#allocation2]   ;;  %s19_s11 = int_to_ptr.hbm [resolvable:$true] %s18_s11 }
   0x3   :  { %s20_s13 = sshll.u32 %s269_s12, 4  ;;  %s35_s16 = sshll.u32 %s341_s1, 4  ;;  %s21_s13 = int_to_ptr.vmem [resolvable:$true] %s20_s13  ;;  %s36_s16 = int_to_ptr.hbm [resolvable:$true] %s35_s16 }
   0x4   :  { %s270_s17 = smov 128   ;;  %s271_s18 = smov 8  }
   0x5   :  { %26 = dma.hbm_to_vmem [thread:$0]  %s19_s11, 256, %s21_s13, [#allocation3], %s270_s17, %s270_s17, %s271_s18  }
   0x6   :  { %s272_s19 = smov [#allocation5]  }
   0x7   :  { %s37_s20 = sshll.u32 %s272_s19, 4  ;;  %s38_s20 = int_to_ptr.vmem [resolvable:$true] %s37_s20 }
   0x8   :  { %43 = dma.hbm_to_vmem [thread:$0]  %s36_s16, 256, %s38_s20, [#allocation6], %s270_s17, %s270_s17, %s271_s18  }
   0x9   :  { %263 = dma.done.wait [#allocation3], 256  }
   0xa   :  { %264 = vsyncadd [#allocation3], 4294967040 }
   0xb   :  { %265 = dma.done.wait [#allocation6], 256  }
   0xc   :  { %266 = vsyncadd [#allocation6], 4294967040  ;;  %v295_v0 = vld [vmem:[#allocation2] sm:$0xff]  ;;  %v297_v1 = vld [vmem:[#allocation2 + $0x8] sm:$0xff]  ;;  %s273_s0 = smov [#allocation7]   ;;  %s162_s23 = sshll.u32 %s342_s2, 4  ;;  %s163_s23 = int_to_ptr.hbm [resolvable:$true] %s162_s23 }
   0xd   :  { %v65_v2 = vand.u32 2147483647, %v295_v0  ;;  %v66_v3 = vand.u32 2147483647, %v297_v1  ;;  %v63_v28 = vld [vmem:[#allocation5] sm:$0xff]  ;;  %v73_v29 = vmax.f32 %v295_v0, 0.0 }
   0xe   :  { %v64_v34 = vld [vmem:[#allocation5 + $0x8] sm:$0xff]  ;;  %v75_v35 = vmul.f32 %v63_v28, %v295_v0  ;;  %vm129_vm8 = vcmp.ge.f32.partialorder %v295_v0, 0.0  ;;  %vm130_vm9 = vcmp.ge.f32.partialorder %v297_v1, 0.0  ;;  %v139_v43 = vsub.f32 1.0, %v63_v28  ;;  %s160_s1 = sshll.u32 %s273_s0, 4  ;;  %s161_s1 = int_to_ptr.vmem [resolvable:$true] %s160_s1 }
   0xf   :  { %v67_v4 = vsub.f32 0.0, %v65_v2  ;;  %v68_v5 = vsub.f32 0.0, %v66_v3  ;;  %v140_v48 = vsub.f32 1.0, %v64_v34  ;;  %v74_v49 = vmax.f32 %v297_v1, 0.0 }
  0x10   :  { %v76_v50 = vmul.f32 %v64_v34, %v297_v1  ;;  %v77_v63 = vsub.f32 %v73_v29, %v75_v35 }
  0x11   :  { %v69_v6 = vmul.f32 1.442695, %v67_v4  ;;  %v71_v7 = vmul.f32 1.442695, %v68_v5 }
  0x12   :  { %v78_v3 = vsub.f32 %v74_v49, %v76_v50 }
  0x13   :  { %179 = vpow2.f32 %v69_v6 }
  0x14   :  { %181 = vpow2.f32 %v71_v7 }
  0x19   :  { %v180_v8 = vpop.eup %179 }
  0x1a   :  { %v301_v9 = vpop.eup %181  ;;  %v79_v10 = vadd.f32 1.0, %v180_v8  ;;  %v82_v22 = vmul.f32 -0.5, %v180_v8  ;;  %v85_v36 = vand.u32 2147483647, %v180_v8 }
  0x1b   :  { %v88_v11 = vadd.f32 1.0, %v301_v9  ;;  %v91_v23 = vmul.f32 -0.5, %v301_v9  ;;  %v94_v45 = vand.u32 2147483647, %v301_v9 }
  0x1c   :  { %183 = vrcp.f32 %v79_v10  ;;  %vm106_vm0 = vweird.f32 %v79_v10  ;;  %v112_v15 = vand.u32 2147483648, %v79_v10  ;;  %v110_v18 = vand.u32 2147483647, %v79_v10 }
  0x1d   :  { %185 = vrcp.f32 %v88_v11  ;;  %v126_v19 = vand.u32 2147483648, %v88_v11  ;;  %vm120_vm2 = vweird.f32 %v88_v11  ;;  %v124_v21 = vand.u32 2147483647, %v88_v11 }
  0x1e   :  { %187 = vlog2.f32 %v79_v10  ;;  %v113_v26 = vor.u32 1.1754944e-38, %v112_v15  ;;  %vm111_vm5 = vcmp.eq.f32.partialorder %v110_v18, 8.507059e+37  ;;  %v83_v38 = vadd.f32 1.0, %v82_v22 }
  0x1f   :  { %189 = vlog2.f32 %v88_v11  ;;  %v127_v32 = vor.u32 1.1754944e-38, %v126_v19  ;;  %vm125_vm7 = vcmp.eq.f32.partialorder %v124_v21, 8.507059e+37  ;;  %v92_v39 = vadd.f32 1.0, %v91_v23 }
  0x20   :  { %vm325_vm10 = vcmp.lt.f32.partialorder %v85_v36, 0.0004427343  ;;  %v84_v54 = vmul.f32 %v180_v8, %v83_v38  ;;  %vm95_vm11 = vcmp.lt.f32.partialorder %v94_v45, 0.0004427343 }
  0x21   :  { %v93_v55 = vmul.f32 %v301_v9, %v92_v39 }
  0x22   :  { %v184_v12 = vpop.eup %183 }
  0x23   :  { %v186_v13 = vpop.eup %185  ;;  %v102_v14 = vmul.f32 %v184_v12, %v79_v10  ;;  %vm107_vm1 = vweird.f32 %v184_v12 }
  0x24   :  { %v116_v16 = vmul.f32 %v186_v13, %v88_v11  ;;  %vm121_vm3 = vweird.f32 %v186_v13  ;;  %vm306_vm4 = vmor %vm106_vm0, %vm107_vm1  ;;  %v188_v33 = vpop.eup %187 }
  0x25   :  { %v103_v17 = vsub.f32 1.0, %v102_v14  ;;  %vm311_vm6 = vmor %vm120_vm2, %vm121_vm3  ;;  %v190_v44 = vpop.eup %189  ;;  %v81_v53 = vmul.f32 0.6931472, %v188_v33 }
  0x26   :  { %v117_v20 = vsub.f32 1.0, %v116_v16  ;;  %v90_v57 = vmul.f32 0.6931472, %v190_v44 }
  0x27   :  { %v104_v24 = vmul.f32 %v184_v12, %v103_v17  ;;  %v87_v4 = vsel %vm325_vm10, %v84_v54, %v81_v53 }
  0x28   :  { %v118_v27 = vmul.f32 %v186_v13, %v117_v20  ;;  %v96_v6 = vsel %vm95_vm11, %v93_v55, %v90_v57 }
  0x29   :  { %v105_v30 = vadd.f32 %v184_v12, %v104_v24  ;;  %v98_v10 = vadd.f32 %v96_v6, %v78_v3 }
  0x2a   :  { %v119_v37 = vadd.f32 %v186_v13, %v118_v27 }
  0x2b   :  { %v109_v40 = vsel %vm306_vm4, %v184_v12, %v105_v30 }
  0x2c   :  { %v114_v41 = vsel %vm111_vm5, %v113_v26, %v109_v40  ;;  %v123_v42 = vsel %vm311_vm6, %v186_v13, %v119_v37 }
  0x2d   :  { %v128_v46 = vsel %vm125_vm7, %v127_v32, %v123_v42  ;;  %v131_v47 = vmul.f32 %v180_v8, %v114_v41  ;;  %v97_v8 = vadd.f32 %v87_v4, %v77_v63 }
  0x2e   :  { %v132_v52 = vmul.f32 %v301_v9, %v128_v46 }
  0x2f   :  { %v133_v56 = vsel %vm129_vm8, %v114_v41, %v131_v47 }
  0x30   :  { %v134_v58 = vsel %vm130_vm9, %v128_v46, %v132_v52  ;;  %v135_v59 = vsub.f32 1.0, %v133_v56  ;;  %v141_v60 = vmul.f32 %v139_v43, %v133_v56 }
  0x31   :  { %v136_v61 = vsub.f32 1.0, %v134_v58  ;;  %v142_v62 = vmul.f32 %v140_v48, %v134_v58 }
  0x32   :  { %v137_v2 = vmul.f32 %v135_v59, %v63_v28 }
  0x33   :  { %v138_v5 = vmul.f32 %v136_v61, %v64_v34 }
  0x34   :  { %v143_v7 = vadd.f32 %v141_v60, %v137_v2 }
  0x35   :  { %v144_v0 = vadd.f32 %v142_v62, %v138_v5 }
  0x36   :  { %v145_v9 = vmul.f32 %v143_v7, %v143_v7 }
  0x37   :  { %v146_v1 = vmul.f32 %v144_v0, %v144_v0 }
  0x38   :  { %v147_v11 = vmul.f32 0.25, %v145_v9 }
  0x39   :  { %v148_v12 = vmul.f32 0.25, %v146_v1 }
  0x3a   :  { %v149_v13 = vmul.f32 %v147_v11, %v97_v8 }
  0x3b   :  { %v150_v14 = vmul.f32 %v148_v12, %v98_v10 }
  0x3d   :  { %v152_v15 = vadd.f32 %v150_v14, %v149_v13 }
  0x3f   :  { %154 = vst [vmem:[#allocation7] sm:$0xff] %v152_v15 }
  0x40   :  { %165 = dma.vmem_to_hbm [thread:$0]  %s161_s1, 128, %s163_s23, [#allocation4]  }
  0x41   :  { %267 = dma.done.wait [#allocation4], 128  }
  0x42   :  { %268 = vsyncadd [#allocation4], 4294967168 }
  0x43   :  { %170 = vsyncpa [#allocation3], 1 }
  0x44   :  { %171 = vsyncpa [#allocation6], 1 }
  0x45   :  { %172 = vsyncpa [#allocation4], 1 }

</bundles_post_ra>
